<compile_context>
chip_gen: v6e
topology: v6e:2x2x1
jax: 0.10.0
libtpu: 0.0.40
codegen_flags: <defaults>
</compile_context>

<pallas_src>
import numpy as np
import jax
import jax.numpy as jnp
from jax.experimental import pallas as pl
from jax.experimental.pallas import tpu as pltpu

TM_MAX = 256    # row tile upper bound (sublane-aligned)
TN_MAX = 1024   # col tile upper bound (lane-dense, multiple of 128)
VMEM_LIMIT = 32 * 1024 * 1024


def _round_up(x, m):
    return ((x + m - 1) // m) * m


def _pick_tiles(n):
    tm = min(TM_MAX, _round_up(n, 8))
    tn = min(TN_MAX, _round_up(n, 128))
    return tm, tn


def _pad2d(x, rows, cols):
    r, c = x.shape
    if r == rows and c == cols:
        return x
    return jnp.pad(x, ((0, rows - r), (0, cols - c)))


# ----------------------------------------------------------------------------
# Kernel 1: similarity = student @ teacher.T + 10 * I        (2-D tiled, MXU)
# ----------------------------------------------------------------------------
def _similarity_kernel(stu_ref, tea_ref, sim_ref):
    i = pl.program_id(0)
    j = pl.program_id(1)
    tm, tn = sim_ref.shape
    # NT matmul: contract feature dim (1) of both operands — no transpose.
    s = jax.lax.dot_general(
        stu_ref[...], tea_ref[...],
        dimension_numbers=(((1,), (1,)), ((), ())),
        preferred_element_type=jnp.float32)
    sim_ref[...] = s

    row0 = i * tm
    col0 = j * tn

    # Only tiles crossed by the global diagonal pay for the identity add.
    @pl.when((row0 < col0 + tn) & (col0 < row0 + tm))
    def _():
        row = jax.lax.broadcasted_iota(jnp.int32, (tm, tn), 0) + row0
        col = jax.lax.broadcasted_iota(jnp.int32, (tm, tn), 1) + col0
        sim_ref[...] = s + jnp.where(
            row == col, jnp.float32(10.0), jnp.float32(0.0))


def similarity_pallas(student, teacher):
    n, d = student.shape
    tm, tn = _pick_tiles(n)
    n_r = _round_up(n, tm)
    n_c = _round_up(n, tn)
    stu = _pad2d(student.astype(jnp.float32), n_r, d)
    tea = _pad2d(teacher.astype(jnp.float32), n_c, d)

    out = pl.pallas_call(
        _similarity_kernel,
        out_shape=jax.ShapeDtypeStruct((n_r, n_c), jnp.float32),
        grid_spec=pltpu.PrefetchScalarGridSpec(
            num_scalar_prefetch=0,
            grid=(n_r // tm, n_c // tn),
            in_specs=[
                pl.BlockSpec((tm, d), lambda i, j: (i, 0)),   # student row tile
                pl.BlockSpec((tn, d), lambda i, j: (j, 0)),   # teacher col tile
            ],
            out_specs=pl.BlockSpec((tm, tn), lambda i, j: (i, j)),
        ),
        compiler_params=pltpu.CompilerParams(
            dimension_semantics=("parallel", "parallel"),
            vmem_limit_bytes=VMEM_LIMIT),
    )(stu, tea)
    return out[:n, :n]


# ----------------------------------------------------------------------------
# Kernel 2: dense pos_ = locality + globality        (2-D tiled, fused select)
#   pos[r, c] = sum_i [c == I_knn[r, i]] * (adj[r, c] + close[r, i])
#   (top-k indices per row are distinct -> matches are disjoint -> select into
#    the accumulator instead of OR-ing boolean masks)
# ----------------------------------------------------------------------------
def _pos_kernel(knn_ref, close_ref, adj_ref, pos_ref):
    j = pl.program_id(1)
    tm, tn = pos_ref.shape
    k = knn_ref.shape[1]
    col = jax.lax.broadcasted_iota(jnp.int32, (tm, tn), 1) + j * tn
    adj = adj_ref[...]
    close_f = close_ref[...]          # already float32 (hoisted in wrapper)
    acc = jnp.zeros((tm, tn), jnp.float32)
    for i in range(k):                # k is small and static -> unrolled
        acc = jnp.where(col == knn_ref[:, i:i + 1],
                        adj + close_f[:, i:i + 1], acc)
    pos_ref[...] = acc


def pos_dense_pallas(I_knn, close_f32, adj):
    n, k = I_knn.shape
    tm, tn = _pick_tiles(n)
    n_r = _round_up(n, tm)
    n_c = _round_up(n, tn)
    knn_p = _pad2d(I_knn.astype(jnp.int32), n_r, k)
    close_p = _pad2d(close_f32.astype(jnp.float32), n_r, k)
    adj_p = _pad2d(adj.astype(jnp.float32), n_r, n_c)

    out = pl.pallas_call(
        _pos_kernel,
        out_shape=jax.ShapeDtypeStruct((n_r, n_c), jnp.float32),
        grid_spec=pltpu.PrefetchScalarGridSpec(
            num_scalar_prefetch=0,
            grid=(n_r // tm, n_c // tn),
            in_specs=[
                pl.BlockSpec((tm, k), lambda i, j: (i, 0)),
                pl.BlockSpec((tm, k), lambda i, j: (i, 0)),
                pl.BlockSpec((tm, tn), lambda i, j: (i, j)),
            ],
            out_specs=pl.BlockSpec((tm, tn), lambda i, j: (i, j)),
        ),
        compiler_params=pltpu.CompilerParams(
            dimension_semantics=("parallel", "parallel"),
            vmem_limit_bytes=VMEM_LIMIT),
    )(knn_p, close_p, adj_p)
    return out[:n, :n]


# ----------------------------------------------------------------------------
# Glue: deterministic k-means (stand-in for faiss.Kmeans)
# ----------------------------------------------------------------------------
def kmeans_labels(x, ncentroids, niter, seed):
    # TODO(synk): faiss.Kmeans replaced by plain-JAX Lloyd iterations with a
    # deterministic per-seed init; faiss's exact internals are not reproducible.
    n, _ = x.shape
    key = jax.random.PRNGKey(1234 + seed)
    init_idx = jax.random.choice(key, n, shape=(ncentroids,), replace=False)
    centroids = x[init_idx]

    def assign(c):
        d2 = (jnp.sum(x * x, 1, keepdims=True)
              - 2.0 * x @ c.T
              + jnp.sum(c * c, 1)[None, :])
        return jnp.argmin(d2, axis=1)

    def body(_, c):
        labels = assign(c)
        onehot = jax.nn.one_hot(labels, ncentroids, dtype=x.dtype)   # (n, nc)
        counts = onehot.sum(0)                                        # (nc,)
        sums = onehot.T @ x                                           # (nc, d)
        return jnp.where(counts[:, None] > 0,
                         sums / jnp.maximum(counts[:, None], 1.0), c)

    centroids = jax.lax.fori_loop(0, niter, body, centroids)
    return assign(centroids).astype(jnp.int32)


# ----------------------------------------------------------------------------
# Neighbor.forward
# ----------------------------------------------------------------------------
def neighbor_forward(adj, student, teacher, top_k,
                     num_centroids, num_kmeans, clus_num_iters):
    # similarity + top-k neighbours
    sim = similarity_pallas(student, teacher)
    _, I_knn = jax.lax.top_k(sim, top_k)                 # (n, k), int32, sorted desc

    # cluster labels from num_kmeans independent k-means runs on teacher
    labels = jnp.stack(
        [kmeans_labels(teacher, num_centroids, clus_num_iters, s)
         for s in range(num_kmeans)], axis=0)            # (num_kmeans, n)

    # all_close_nei_in_back: OR over runs of "same cluster as the neighbour"
    batch_labels = labels[:, :, None]                    # (km, n, 1)
    top_labels = jnp.take(labels, I_knn, axis=1)         # (km, n, k)
    close = jnp.any(batch_labels == top_labels, axis=0).astype(jnp.float32)  # (n, k)

    # dense pos_ = locality + globality
    pos_dense = pos_dense_pallas(I_knn, close, adj)

    # host-side: sparse COO indices of pos_ (dynamic nnz -> numpy)
    pos_np = np.asarray(jax.block_until_ready(pos_dense))
    rows, cols = np.nonzero(pos_np)
    indices = np.stack([rows, cols], axis=0).astype(np.int64)
    return indices, int(I_knn.shape[1])


if __name__ == "__main__":
    # small deterministic setup
    n, d, top_k = 256, 32, 8
    num_centroids, num_kmeans, clus_num_iters = 4, 3, 5

    key = jax.random.PRNGKey(0)
    k_s, k_t, k_a = jax.random.split(key, 3)
    student = jax.random.normal(k_s, (n, d), dtype=jnp.float32)
    teacher = jax.random.normal(k_t, (n, d), dtype=jnp.float32)
    # dense 0/1 symmetric adjacency with self loops (stand-in for sparse adj)
    adj_rand = (jax.random.uniform(k_a, (n, n)) < 0.05).astype(jnp.float32)
    adj = jnp.clip(adj_rand + adj_rand.T + jnp.eye(n, dtype=jnp.float32), 0.0, 1.0)

    indices, k_out = neighbor_forward(
        adj, student, teacher, top_k, num_centroids, num_kmeans, clus_num_iters)

    assert indices.shape[0] == 2 and indices.shape[1] > 0
    assert k_out == top_k
    print("KERNEL_OK")
</pallas_src>

<mosaic_0001>
module attributes {stable_mosaic.version = 11 : i64} {
  func.func @_similarity_kernel(%arg0: i32, %arg1: i32, %arg2: memref<256x32xf32, #tpu.memory_space<vmem>>, %arg3: memref<256x32xf32, #tpu.memory_space<vmem>>, %arg4: memref<256x256xf32, #tpu.memory_space<vmem>>) attributes {dimension_semantics = [#tpu.dimension_semantics<parallel>, #tpu.dimension_semantics<parallel>], iteration_bounds = array<i64: 1, 1>, scalar_prefetch = 0 : i64, scratch_operands = 0 : i64, tpu.core_type = #tpu.core_type<tc>, window_params = [{transform_indices = @transform_0, window_bounds = array<i64: 256, 32>}, {transform_indices = @transform_1, window_bounds = array<i64: 256, 32>}, {transform_indices = @transform_2, window_bounds = array<i64: 256, 256>}]} {
    %c0 = arith.constant 0 : index
    %c0_0 = arith.constant 0 : index
    %0 = vector.load %arg2[%c0, %c0_0] : memref<256x32xf32, #tpu.memory_space<vmem>>, vector<256x32xf32>
    %c0_1 = arith.constant 0 : index
    %c0_2 = arith.constant 0 : index
    %1 = vector.load %arg3[%c0_1, %c0_2] : memref<256x32xf32, #tpu.memory_space<vmem>>, vector<256x32xf32>
    %cst = arith.constant dense<0.000000e+00> : vector<256x256xf32>
    %2 = tpu.matmul %0, %1, %cst {dimension_numbers = #tpu.dot_dimension_numbers<[1], [1], [0], [0], [0, 0, 1, 0], [], []>} : vector<256x32xf32>, vector<256x32xf32>, vector<256x256xf32> -> vector<256x256xf32>
    %c0_3 = arith.constant 0 : index
    %c0_4 = arith.constant 0 : index
    %3 = vector.load %arg4[%c0_3, %c0_4] : memref<256x256xf32, #tpu.memory_space<vmem>>, vector<256x256xf32>
    tpu.vector_store %arg4[%c0_3, %c0_4], %2 {strides = array<i32>} : memref<256x256xf32, #tpu.memory_space<vmem>>, vector<256x256xf32>,
    %c256_i32 = arith.constant 256 : i32
    %4 = arith.muli %arg0, %c256_i32 : i32
    %c256_i32_5 = arith.constant 256 : i32
    %5 = arith.muli %arg1, %c256_i32_5 : i32
    %c256_i32_6 = arith.constant 256 : i32
    %6 = arith.addi %5, %c256_i32_6 : i32
    %7 = arith.cmpi slt, %4, %6 : i32
    %c256_i32_7 = arith.constant 256 : i32
    %8 = arith.addi %4, %c256_i32_7 : i32
    %9 = arith.cmpi slt, %5, %8 : i32
    %10 = arith.andi %7, %9 : i1
    %11 = arith.extui %10 : i1 to i32
    %c0_i32 = arith.constant 0 : i32
    %12 = arith.cmpi ne, %11, %c0_i32 : i32
    scf.if %12 {
      %13 = tpu.iota {dimensions = array<i32: 0>} : vector<256x256xi32>
      %14 = vector.broadcast %4 : i32 to vector<256x256xi32>
      %15 = arith.addi %13, %14 : vector<256x256xi32>
      %16 = tpu.iota {dimensions = array<i32: 1>} : vector<256x256xi32>
      %17 = vector.broadcast %5 : i32 to vector<256x256xi32>
      %18 = arith.addi %16, %17 : vector<256x256xi32>
      %19 = arith.cmpi eq, %15, %18 : vector<256x256xi32>
      %cst_8 = arith.constant 1.000000e+01 : f32
      %cst_9 = arith.constant 0.000000e+00 : f32
      %20 = vector.broadcast %cst_8 : f32 to vector<256x256xf32>
      %21 = vector.broadcast %cst_9 : f32 to vector<256x256xf32>
      %22 = arith.select %19, %20, %21 : vector<256x256xi1>, vector<256x256xf32>
      %23 = arith.addf %2, %22 : vector<256x256xf32>
      %c0_10 = arith.constant 0 : index
      %c0_11 = arith.constant 0 : index
      %24 = vector.load %arg4[%c0_10, %c0_11] : memref<256x256xf32, #tpu.memory_space<vmem>>, vector<256x256xf32>
      tpu.vector_store %arg4[%c0_10, %c0_11], %23 {strides = array<i32>} : memref<256x256xf32, #tpu.memory_space<vmem>>, vector<256x256xf32>,
    } else {
    }
    return
  }
  func.func @transform_0(%arg0: i32, %arg1: i32) -> (i32, i32) {
    %c0_i32 = arith.constant 0 : i32
    %c0_i32_0 = arith.constant 0 : i32
    return %arg0, %c0_i32 : i32, i32
  }
  func.func @transform_1(%arg0: i32, %arg1: i32) -> (i32, i32) {
    %c0_i32 = arith.constant 0 : i32
    %c0_i32_0 = arith.constant 0 : i32
    return %arg1, %c0_i32 : i32, i32
  }
  func.func @transform_2(%arg0: i32, %arg1: i32) -> (i32, i32) {
    %c0_i32 = arith.constant 0 : i32
    return %arg0, %arg1 : i32, i32
  }
}

</mosaic_0001>

<bundles_post_ra>
// kernel: tpu_custom_call.1
= control target key start
LH: loop header
LB: loop body
LE: loop exit
PB: predicated region body
PF: predicated region fallthrough
CT: control target
= control target key end

     0   :  { %vm76_vm0 = vcmask 261120   ;;  %s1615_s0 = inlined_call_operand.vmem [shape: f32[256,32], index: 0, kind: input, shape index: {}]   ;;  %s1616_s1 = inlined_call_operand.vmem [shape: f32[256,32], index: 1, kind: input, shape index: {}]   ;;  %s1617_s2 = inlined_call_operand.hbm [shape: f32[256,256], index: 2, kind: output, shape index: {}]  }
   0x1   :  { %v75_v0 = vld [vmem:[%s1616_s1 + $0xf8] sm:$0xff]  ;;  %v74_v2 = vld [vmem:[%s1616_s1 + $0xf0] sm:$0xff]  ;;  %v73_v4 = vld [vmem:[%s1616_s1 + $0xe8] sm:$0xff] }
   0x2   :  { %v59_v1 = vld [vmem:[%s1616_s1 + $0x78] sm:$0xff]  ;;  %1008 = vmatprep.subr.msk.mxu0 %vm76_vm0, %v75_v0  ;;  %1104 = vmatprep.subr.msk.mxu1 %vm76_vm0, %v75_v0  ;;  %v58_v3 = vld [vmem:[%s1616_s1 + $0x70] sm:$0xff]  ;;  %v57_v5 = vld [vmem:[%s1616_s1 + $0x68] sm:$0xff] }
   0x3   :  { %1009 = vmatpush3.xpose.msk.msra.mxu0 %vm76_vm0, %v59_v1  ;;  %1120 = vmatpush3.xpose.msk.msra.mxu1 %vm76_vm0, %v59_v1  ;;  %v72_v6 = vld [vmem:[%s1616_s1 + $0xe0] sm:$0xff]  ;;  %v71_v10 = vld [vmem:[%s1616_s1 + $0xd8] sm:$0xff]  ;;  %v70_v12 = vld [vmem:[%s1616_s1 + $0xd0] sm:$0xff] }
   0x4   :  { %1010 = vmatprep.subr.msk.mxu0 %vm76_vm0, %v74_v2  ;;  %1105 = vmatprep.subr.msk.mxu1 %vm76_vm0, %v74_v2  ;;  %v1217_v7 = vld [vmem:[%s1615_s0] sm:$0xff]  ;;  %v55_v11 = vld [vmem:[%s1616_s1 + $0x58] sm:$0xff]  ;;  %v54_v13 = vld [vmem:[%s1616_s1 + $0x50] sm:$0xff] }
   0x5   :  { %v56_v8 = vld [vmem:[%s1616_s1 + $0x60] sm:$0xff]  ;;  %1040 = vmatprep.mubr.msk.f32.mxu0 %vm76_vm0, %v1217_v7  ;;  %v69_v14 = vld [vmem:[%s1616_s1 + $0xc8] sm:$0xff] }
   0x6   :  { %v1227_v9 = vld [vmem:[%s1615_s0 + $0x80] sm:$0xff] }
   0x7   :  { %1011 = vmatpush3.xpose.msk.msra.mxu0 %vm76_vm0, %v58_v3  ;;  %1121 = vmatpush3.xpose.msk.msra.mxu1 %vm76_vm0, %v58_v3 }
   0x8   :  { %1012 = vmatprep.subr.msk.mxu0 %vm76_vm0, %v73_v4  ;;  %1106 = vmatprep.subr.msk.mxu1 %vm76_vm0, %v73_v4 }
   0x9   :  { %1072 = vmatprep.mubr.msk.f32.mxu1 %vm76_vm0, %v1227_v9 }
   0xb   :  { %1013 = vmatpush3.xpose.msk.msra.mxu0 %vm76_vm0, %v57_v5  ;;  %1122 = vmatpush3.xpose.msk.msra.mxu1 %vm76_vm0, %v57_v5 }
   0xc   :  { %1014 = vmatprep.subr.msk.mxu0 %vm76_vm0, %v72_v6  ;;  %1107 = vmatprep.subr.msk.mxu1 %vm76_vm0, %v72_v6 }
   0xf   :  { %1015 = vmatpush3.xpose.msk.msra.mxu0 %vm76_vm0, %v56_v8  ;;  %1123 = vmatpush3.xpose.msk.msra.mxu1 %vm76_vm0, %v56_v8 }
  0x10   :  { %1016 = vmatprep.subr.msk.mxu0 %vm76_vm0, %v71_v10  ;;  %1108 = vmatprep.subr.msk.mxu1 %vm76_vm0, %v71_v10 }
  0x13   :  { %1017 = vmatpush3.xpose.msk.msra.mxu0 %vm76_vm0, %v55_v11  ;;  %1124 = vmatpush3.xpose.msk.msra.mxu1 %vm76_vm0, %v55_v11 }
  0x14   :  { %1018 = vmatprep.subr.msk.mxu0 %vm76_vm0, %v70_v12  ;;  %1109 = vmatprep.subr.msk.mxu1 %vm76_vm0, %v70_v12 }
  0x15   :  { %7 = vsyncpa [#allocation3], 0  ;;  %v53_v15 = vld [vmem:[%s1616_s1 + $0x48] sm:$0xff]  ;;  %v68_v16 = vld [vmem:[%s1616_s1 + $0xc0] sm:$0xff]  ;;  %v600_v0 = vlaneseq }
  0x16   :  { %v52_v17 = vld [vmem:[%s1616_s1 + $0x40] sm:$0xff]  ;;  %v67_v18 = vld [vmem:[%s1616_s1 + $0xb8] sm:$0xff]  ;;  %v66_v20 = vld [vmem:[%s1616_s1 + $0xb0] sm:$0xff] }
  0x17   :  { %1019 = vmatpush3.xpose.msk.msra.mxu0 %vm76_vm0, %v54_v13  ;;  %1125 = vmatpush3.xpose.msk.msra.mxu1 %vm76_vm0, %v54_v13  ;;  %v51_v19 = vld [vmem:[%s1616_s1 + $0x38] sm:$0xff]  ;;  %v50_v21 = vld [vmem:[%s1616_s1 + $0x30] sm:$0xff]  ;;  %v65_v22 = vld [vmem:[%s1616_s1 + $0xa8] sm:$0xff]  ;;  %v1509_v1 = vshrl.u32 %v600_v0, 7  ;;  %v1511_v2 = vand.u32 127, %v600_v0 }
  0x18   :  { %1020 = vmatprep.subr.msk.mxu0 %vm76_vm0, %v69_v14  ;;  %1110 = vmatprep.subr.msk.mxu1 %vm76_vm0, %v69_v14  ;;  %v49_v23 = vld [vmem:[%s1616_s1 + $0x28] sm:$0xff]  ;;  %v64_v24 = vld [vmem:[%s1616_s1 + $0xa0] sm:$0xff]  ;;  %v63_v26 = vld [vmem:[%s1616_s1 + $0x98] sm:$0xff] }
  0x19   :  { %v48_v25 = vld [vmem:[%s1616_s1 + $0x20] sm:$0xff]  ;;  %v47_v27 = vld [vmem:[%s1616_s1 + $0x18] sm:$0xff]  ;;  %v62_v28 = vld [vmem:[%s1616_s1 + $0x90] sm:$0xff]  ;;  %v617_v3 = vadd.s32 128, %v1509_v1  ;;  %v1515_v4 = vadd.s32 128, %v1511_v2  ;;  %vm672_vm1 = vcmp.eq.s32.totalorder %v1509_v1, %v1511_v2  ;;  %v602_v5 = vadd.s32 8, %v1509_v1 }
  0x1a   :  { %v46_v29 = vld [vmem:[%s1616_s1 + $0x10] sm:$0xff]  ;;  %v61_v30 = vld [vmem:[%s1616_s1 + $0x88] sm:$0xff]  ;;  %v60_v32 = vld [vmem:[%s1616_s1 + $0x80] sm:$0xff]  ;;  %v618_v6 = vadd.s32 136, %v1509_v1  ;;  %v619_v14 = vadd.s32 144, %v1509_v1  ;;  %v624_v0 = vadd.s32 184, %v1509_v1 }
  0x1b   :  { %1021 = vmatpush3.xpose.msk.msra.mxu0 %vm76_vm0, %v53_v15  ;;  %1126 = vmatpush3.xpose.msk.msra.mxu1 %vm76_vm0, %v53_v15  ;;  %v45_v31 = vld [vmem:[%s1616_s1 + $0x8] sm:$0xff]  ;;  %v44_v33 = vld [vmem:[%s1616_s1] sm:$0xff]  ;;  %v14_v36 = vld [vmem:[%s1615_s0 + $0x10] sm:$0xff]  ;;  %vm705_vm2 = vcmp.eq.s32.totalorder %v617_v3, %v1515_v4  ;;  %vm674_vm3 = vcmp.eq.s32.totalorder %v602_v5, %v1511_v2 }
  0x1c   :  { %1022 = vmatprep.subr.msk.mxu0 %vm76_vm0, %v68_v16  ;;  %1111 = vmatprep.subr.msk.mxu1 %vm76_vm0, %v68_v16  ;;  %v13_v34 = vld [vmem:[%s1615_s0 + $0x8] sm:$0xff]  ;;  %v30_v37 = vld [vmem:[%s1615_s0 + $0x90] sm:$0xff]  ;;  %v15_v38 = vld [vmem:[%s1615_s0 + $0x18] sm:$0xff]  ;;  %vm707_vm4 = vcmp.eq.s32.totalorder %v618_v6, %v1515_v4  ;;  %vm709_vm6 = vcmp.eq.s32.totalorder %v619_v14, %v1515_v4  ;;  %v625_v14 = vadd.s32 192, %v1509_v1 }
  0x1d   :  { %v29_v35 = vld [vmem:[%s1615_s0 + $0x88] sm:$0xff]  ;;  %v31_v39 = vld [vmem:[%s1615_s0 + $0x98] sm:$0xff]  ;;  %v16_v40 = vld [vmem:[%s1615_s0 + $0x20] sm:$0xff] }
  0x1e   :  { %v32_v41 = vld [vmem:[%s1615_s0 + $0xa0] sm:$0xff]  ;;  %v17_v42 = vld [vmem:[%s1615_s0 + $0x28] sm:$0xff]  ;;  %v18_v44 = vld [vmem:[%s1615_s0 + $0x30] sm:$0xff] }
  0x1f   :  { %1023 = vmatpush3.xpose.msk.msra.mxu0 %vm76_vm0, %v52_v17  ;;  %1127 = vmatpush3.xpose.msk.msra.mxu1 %vm76_vm0, %v52_v17  ;;  %v33_v43 = vld [vmem:[%s1615_s0 + $0xa8] sm:$0xff]  ;;  %v34_v45 = vld [vmem:[%s1615_s0 + $0xb0] sm:$0xff]  ;;  %v19_v46 = vld [vmem:[%s1615_s0 + $0x38] sm:$0xff] }
  0x20   :  { %1024 = vmatprep.subr.msk.mxu0 %vm76_vm0, %v67_v18  ;;  %1112 = vmatprep.subr.msk.mxu1 %vm76_vm0, %v67_v18  ;;  %v35_v47 = vld [vmem:[%s1615_s0 + $0xb8] sm:$0xff]  ;;  %v20_v48 = vld [vmem:[%s1615_s0 + $0x40] sm:$0xff]  ;;  %v21_v50 = vld [vmem:[%s1615_s0 + $0x48] sm:$0xff] }
  0x21   :  { %v36_v49 = vld [vmem:[%s1615_s0 + $0xc0] sm:$0xff]  ;;  %v37_v51 = vld [vmem:[%s1615_s0 + $0xc8] sm:$0xff]  ;;  %v22_v52 = vld [vmem:[%s1615_s0 + $0x50] sm:$0xff] }
  0x22   :  { %v38_v53 = vld [vmem:[%s1615_s0 + $0xd0] sm:$0xff]  ;;  %v23_v54 = vld [vmem:[%s1615_s0 + $0x58] sm:$0xff]  ;;  %v24_v56 = vld [vmem:[%s1615_s0 + $0x60] sm:$0xff] }
  0x23   :  { %1025 = vmatpush3.xpose.msk.msra.mxu0 %vm76_vm0, %v51_v19  ;;  %1128 = vmatpush3.xpose.msk.msra.mxu1 %vm76_vm0, %v51_v19  ;;  %v39_v55 = vld [vmem:[%s1615_s0 + $0xd8] sm:$0xff]  ;;  %v40_v57 = vld [vmem:[%s1615_s0 + $0xe0] sm:$0xff]  ;;  %v25_v58 = vld [vmem:[%s1615_s0 + $0x68] sm:$0xff]  ;;  %v604_v19 = vadd.s32 24, %v1509_v1 }
  0x24   :  { %1026 = vmatprep.subr.msk.mxu0 %vm76_vm0, %v66_v20  ;;  %1113 = vmatprep.subr.msk.mxu1 %vm76_vm0, %v66_v20  ;;  %v41_v59 = vld [vmem:[%s1615_s0 + $0xe8] sm:$0xff]  ;;  %v26_v60 = vld [vmem:[%s1615_s0 + $0x70] sm:$0xff]  ;;  %v27_v62 = vld [vmem:[%s1615_s0 + $0x78] sm:$0xff] }
  0x25   :  { %v42_v61 = vld [vmem:[%s1615_s0 + $0xf0] sm:$0xff]  ;;  %v43_v63 = vld [vmem:[%s1615_s0 + $0xf8] sm:$0xff]  ;;  %vm678_vm7 = vcmp.eq.s32.totalorder %v604_v19, %v1511_v2  ;;  %v610_v19 = vadd.s32 72, %v1509_v1  ;;  %s1163_s0 = smov [#allocation2]  }
  0x26   :  { %s933_s23 = sshll.u32 %s1163_s0, 4  ;;  %s934_s23 = int_to_ptr.vmem [resolvable:$true] %s933_s23 }
  0x27   :  { %1027 = vmatpush3.xpose.msk.msra.mxu0 %vm76_vm0, %v50_v21  ;;  %1129 = vmatpush3.xpose.msk.msra.mxu1 %vm76_vm0, %v50_v21  ;;  %s1140_s24 = scalar_lea.vmem %s934_s23, 8192  ;;  %p1145_p1 = scmp.lt.s32.totalorder %s934_s23, %s934_s23 }
  0x28   :  { %1028 = vmatprep.subr.msk.mxu0 %vm76_vm0, %v65_v22  ;;  %1114 = vmatprep.subr.msk.mxu1 %vm76_vm0, %v65_v22  ;;  %p1141_p0 = scmp.ne.s32.totalorder %s934_s23, %s1140_s24  ;;  %p1146_p2 = scmp.lt.s32.totalorder %s1140_s24, %s1140_s24 }
  0x2a   :  { %p1147_p3 = por %p1146_p2, %p1145_p1 }
  0x2b   :  { %1029 = vmatpush3.xpose.msk.msra.mxu0 %vm76_vm0, %v49_v23  ;;  %1130 = vmatpush3.xpose.msk.msra.mxu1 %vm76_vm0, %v49_v23 }
  0x2c   :  { %1030 = vmatprep.subr.msk.mxu0 %vm76_vm0, %v64_v24  ;;  %1115 = vmatprep.subr.msk.mxu1 %vm76_vm0, %v64_v24  ;;  %v620_v24 = vadd.s32 152, %v1509_v1  ;;  %p1148_p4 = pnand %p1147_p3, %p1141_p0 }
  0x2e   :  { %vm711_vm8 = vcmp.eq.s32.totalorder %v620_v24, %v1515_v4  ;;  %v626_v24 = vadd.s32 200, %v1509_v1 }
  0x2f   :  { %1031 = vmatpush3.xpose.msk.msra.mxu0 %vm76_vm0, %v48_v25  ;;  %1131 = vmatpush3.xpose.msk.msra.mxu1 %vm76_vm0, %v48_v25 }
  0x30   :  { %1032 = vmatprep.subr.msk.mxu0 %vm76_vm0, %v63_v26  ;;  %1116 = vmatprep.subr.msk.mxu1 %vm76_vm0, %v63_v26 }
  0x33   :  { %1033 = vmatpush3.xpose.msk.msra.mxu0 %vm76_vm0, %v47_v27  ;;  %1132 = vmatpush3.xpose.msk.msra.mxu1 %vm76_vm0, %v47_v27 }
  0x34   :  { %1034 = vmatprep.subr.msk.mxu0 %vm76_vm0, %v62_v28  ;;  %1117 = vmatprep.subr.msk.mxu1 %vm76_vm0, %v62_v28 }
  0x37   :  { %1035 = vmatpush3.xpose.msk.msra.mxu0 %vm76_vm0, %v46_v29  ;;  %1133 = vmatpush3.xpose.msk.msra.mxu1 %vm76_vm0, %v46_v29  ;;  %v605_v29 = vadd.s32 32, %v1509_v1 }
  0x38   :  { %1036 = vmatprep.subr.msk.mxu0 %vm76_vm0, %v61_v30  ;;  %1118 = vmatprep.subr.msk.mxu1 %vm76_vm0, %v61_v30 }
  0x39   :  { %vm680_vm9 = vcmp.eq.s32.totalorder %v605_v29, %v1511_v2  ;;  %v611_v29 = vadd.s32 80, %v1509_v1 }
  0x3b   :  { %1037 = vmatpush3.xpose.msk.msra.mxu0 %vm76_vm0, %v45_v31  ;;  %1134 = vmatpush3.xpose.msk.msra.mxu1 %vm76_vm0, %v45_v31 }
  0x3c   :  { %1038 = vmatprep.subr.msk.mxu0 %vm76_vm0, %v60_v32  ;;  %1119 = vmatprep.subr.msk.mxu1 %vm76_vm0, %v60_v32 }
  0x3f   :  { %1039 = vmatpush3.xpose.msk.msra.mxu0 %vm76_vm0, %v44_v33  ;;  %1135 = vmatpush3.xpose.msk.msra.mxu1 %vm76_vm0, %v44_v33 }
  0x42   :  { %1041 = vmatmul.mubr.msk.f32.vlgmr.msra.gmra.mxu0 %vm76_vm0, %v1217_v7  ;;  %1073 = vmatmul.mubr.msk.f32.vlgmr.msra.gmra.mxu1 %vm76_vm0, %v1227_v9  ;;  %v1162_v7 = vmov 0.0   ;;  %v603_v9 = vadd.s32 16, %v1509_v1 }
  0x43   :  { %1042 = vmatprep.mubr.msk.f32.mxu0 %vm76_vm0, %v13_v34  ;;  %1074 = vmatprep.mubr.msk.f32.mxu1 %vm76_vm0, %v29_v35  ;;  %v736_v8 = vsel %vm672_vm1, 10.0, %v1162_v7  ;;  %v769_v12 = vsel %vm705_vm2, 10.0, %v1162_v7  ;;  %v738_v17 = vsel %vm674_vm3, 10.0, %v1162_v7  ;;  %v771_v22 = vsel %vm707_vm4, 10.0, %v1162_v7 }
  0x44   :  { %vm676_vm5 = vcmp.eq.s32.totalorder %v603_v9, %v1511_v2  ;;  %v773_v32 = vsel %vm709_vm6, 10.0, %v1162_v7  ;;  %v609_v9 = vadd.s32 64, %v1509_v1  ;;  %vm721_vm2 = vcmp.eq.s32.totalorder %v625_v14, %v1515_v4 }
  0x45   :  { %v740_v27 = vsel %vm676_vm5, 10.0, %v1162_v7  ;;  %vm690_vm3 = vcmp.eq.s32.totalorder %v610_v19, %v1511_v2  ;;  %vm723_vm4 = vcmp.eq.s32.totalorder %v626_v24, %v1515_v4  ;;  %vm692_vm5 = vcmp.eq.s32.totalorder %v611_v29, %v1511_v2 }
  0x46   :  { %1043 = vmatmul.mubr.msk.f32.gmra.mxu0 %vm76_vm0, %v13_v34  ;;  %1075 = vmatmul.mubr.msk.f32.gmra.mxu1 %vm76_vm0, %v29_v35  ;;  %v621_v34 = vadd.s32 160, %v1509_v1  ;;  %vm688_vm1 = vcmp.eq.s32.totalorder %v609_v9, %v1511_v2  ;;  %v615_v9 = vadd.s32 112, %v1509_v1  ;;  %v631_v14 = vadd.s32 240, %v1509_v1 }
  0x47   :  { %1044 = vmatprep.mubr.msk.f32.mxu0 %vm76_vm0, %v14_v36  ;;  %1076 = vmatprep.mubr.msk.f32.mxu1 %vm76_vm0, %v30_v37  ;;  %v616_v19 = vadd.s32 120, %v1509_v1  ;;  %v632_v24 = vadd.s32 248, %v1509_v1 }
  0x48   :  { %vm713_vm10 = vcmp.eq.s32.totalorder %v621_v34, %v1515_v4  ;;  %v627_v34 = vadd.s32 208, %v1509_v1 }
  0x4a   :  { %1045 = vmatmul.mubr.msk.f32.gmra.mxu0 %vm76_vm0, %v14_v36  ;;  %1077 = vmatmul.mubr.msk.f32.gmra.mxu1 %vm76_vm0, %v30_v37  ;;  %v742_v37 = vsel %vm678_vm7, 10.0, %v1162_v7  ;;  %vm725_vm6 = vcmp.eq.s32.totalorder %v627_v34, %v1515_v4 }
  0x4b   :  { %1046 = vmatprep.mubr.msk.f32.mxu0 %vm76_vm0, %v15_v38  ;;  %1078 = vmatprep.mubr.msk.f32.mxu1 %vm76_vm0, %v31_v39 }
  0x4e   :  { %1047 = vmatmul.mubr.msk.f32.gmra.mxu0 %vm76_vm0, %v15_v38  ;;  %1079 = vmatmul.mubr.msk.f32.gmra.mxu1 %vm76_vm0, %v31_v39  ;;  %v606_v39 = vadd.s32 40, %v1509_v1 }
  0x4f   :  { %1048 = vmatprep.mubr.msk.f32.mxu0 %vm76_vm0, %v16_v40  ;;  %1080 = vmatprep.mubr.msk.f32.mxu1 %vm76_vm0, %v32_v41 }
  0x50   :  { %vm682_vm11 = vcmp.eq.s32.totalorder %v606_v39, %v1511_v2  ;;  %v612_v39 = vadd.s32 88, %v1509_v1 }
  0x52   :  { %1049 = vmatmul.mubr.msk.f32.gmra.mxu0 %vm76_vm0, %v16_v40  ;;  %1081 = vmatmul.mubr.msk.f32.gmra.mxu1 %vm76_vm0, %v32_v41  ;;  %vm694_vm7 = vcmp.eq.s32.totalorder %v612_v39, %v1511_v2 }
  0x53   :  { %1050 = vmatprep.mubr.msk.f32.mxu0 %vm76_vm0, %v17_v42  ;;  %1082 = vmatprep.mubr.msk.f32.mxu1 %vm76_vm0, %v33_v43 }
  0x56   :  { %1051 = vmatmul.mubr.msk.f32.gmra.mxu0 %vm76_vm0, %v17_v42  ;;  %1083 = vmatmul.mubr.msk.f32.gmra.mxu1 %vm76_vm0, %v33_v43  ;;  %v775_v42 = vsel %vm711_vm8, 10.0, %v1162_v7 }
  0x57   :  { %1052 = vmatprep.mubr.msk.f32.mxu0 %vm76_vm0, %v18_v44  ;;  %1084 = vmatprep.mubr.msk.f32.mxu1 %vm76_vm0, %v34_v45 }
  0x5a   :  { %1053 = vmatmul.mubr.msk.f32.gmra.mxu0 %vm76_vm0, %v18_v44  ;;  %1085 = vmatmul.mubr.msk.f32.gmra.mxu1 %vm76_vm0, %v34_v45  ;;  %v622_v44 = vadd.s32 168, %v1509_v1 }
  0x5b   :  { %1054 = vmatprep.mubr.msk.f32.mxu0 %vm76_vm0, %v19_v46  ;;  %1086 = vmatprep.mubr.msk.f32.mxu1 %vm76_vm0, %v35_v47 }
  0x5c   :  { %vm715_vm12 = vcmp.eq.s32.totalorder %v622_v44, %v1515_v4  ;;  %v628_v44 = vadd.s32 216, %v1509_v1 }
  0x5e   :  { %1055 = vmatmul.mubr.msk.f32.gmra.mxu0 %vm76_vm0, %v19_v46  ;;  %1087 = vmatmul.mubr.msk.f32.gmra.mxu1 %vm76_vm0, %v35_v47  ;;  %v744_v47 = vsel %vm680_vm9, 10.0, %v1162_v7  ;;  %vm727_vm8 = vcmp.eq.s32.totalorder %v628_v44, %v1515_v4 }
  0x5f   :  { %1056 = vmatprep.mubr.msk.f32.mxu0 %vm76_vm0, %v20_v48  ;;  %1088 = vmatprep.mubr.msk.f32.mxu1 %vm76_vm0, %v36_v49 }
  0x62   :  { %1057 = vmatmul.mubr.msk.f32.gmra.mxu0 %vm76_vm0, %v20_v48  ;;  %1089 = vmatmul.mubr.msk.f32.gmra.mxu1 %vm76_vm0, %v36_v49  ;;  %v607_v49 = vadd.s32 48, %v1509_v1 }
  0x63   :  { %1058 = vmatprep.mubr.msk.f32.mxu0 %vm76_vm0, %v21_v50  ;;  %1090 = vmatprep.mubr.msk.f32.mxu1 %vm76_vm0, %v37_v51 }
  0x64   :  { %vm684_vm13 = vcmp.eq.s32.totalorder %v607_v49, %v1511_v2  ;;  %v613_v49 = vadd.s32 96, %v1509_v1 }
  0x65   :  { %v748_v6 = vsel %vm684_vm13, 10.0, %v1162_v7  ;;  %vm700_vm13 = vcmp.eq.s32.totalorder %v615_v9, %v1511_v2 }
  0x66   :  { %1059 = vmatmul.mubr.msk.f32.gmra.mxu0 %vm76_vm0, %v21_v50  ;;  %1091 = vmatmul.mubr.msk.f32.gmra.mxu1 %vm76_vm0, %v37_v51  ;;  %vm696_vm9 = vcmp.eq.s32.totalorder %v613_v49, %v1511_v2 }
  0x67   :  { %1060 = vmatprep.mubr.msk.f32.mxu0 %vm76_vm0, %v22_v52  ;;  %1092 = vmatprep.mubr.msk.f32.mxu1 %vm76_vm0, %v38_v53 }
  0x6a   :  { %1061 = vmatmul.mubr.msk.f32.gmra.mxu0 %vm76_vm0, %v22_v52  ;;  %1093 = vmatmul.mubr.msk.f32.gmra.mxu1 %vm76_vm0, %v38_v53  ;;  %v777_v52 = vsel %vm713_vm10, 10.0, %v1162_v7 }
  0x6b   :  { %1062 = vmatprep.mubr.msk.f32.mxu0 %vm76_vm0, %v23_v54  ;;  %1094 = vmatprep.mubr.msk.f32.mxu1 %vm76_vm0, %v39_v55 }
  0x6e   :  { %1063 = vmatmul.mubr.msk.f32.gmra.mxu0 %vm76_vm0, %v23_v54  ;;  %1095 = vmatmul.mubr.msk.f32.gmra.mxu1 %vm76_vm0, %v39_v55  ;;  %v623_v54 = vadd.s32 176, %v1509_v1 }
  0x6f   :  { %1064 = vmatprep.mubr.msk.f32.mxu0 %vm76_vm0, %v24_v56  ;;  %1096 = vmatprep.mubr.msk.f32.mxu1 %vm76_vm0, %v40_v57 }
  0x70   :  { %vm717_vm14 = vcmp.eq.s32.totalorder %v623_v54, %v1515_v4  ;;  %v629_v54 = vadd.s32 224, %v1509_v1 }
  0x72   :  { %1065 = vmatmul.mubr.msk.f32.gmra.mxu0 %vm76_vm0, %v24_v56  ;;  %1097 = vmatmul.mubr.msk.f32.gmra.mxu1 %vm76_vm0, %v40_v57  ;;  %v746_v57 = vsel %vm682_vm11, 10.0, %v1162_v7  ;;  %vm729_vm10 = vcmp.eq.s32.totalorder %v629_v54, %v1515_v4 }
  0x73   :  { %1066 = vmatprep.mubr.msk.f32.mxu0 %vm76_vm0, %v25_v58  ;;  %1098 = vmatprep.mubr.msk.f32.mxu1 %vm76_vm0, %v41_v59 }
  0x76   :  { %1067 = vmatmul.mubr.msk.f32.gmra.mxu0 %vm76_vm0, %v25_v58  ;;  %1099 = vmatmul.mubr.msk.f32.gmra.mxu1 %vm76_vm0, %v41_v59  ;;  %v608_v59 = vadd.s32 56, %v1509_v1 }
  0x77   :  { %1068 = vmatprep.mubr.msk.f32.mxu0 %vm76_vm0, %v26_v60  ;;  %1100 = vmatprep.mubr.msk.f32.mxu1 %vm76_vm0, %v42_v61 }
  0x78   :  { %vm686_vm15 = vcmp.eq.s32.totalorder %v608_v59, %v1511_v2  ;;  %v614_v59 = vadd.s32 104, %v1509_v1 }
  0x7a   :  { %1069 = vmatmul.mubr.msk.f32.gmra.mxu0 %vm76_vm0, %v26_v60  ;;  %1101 = vmatmul.mubr.msk.f32.gmra.mxu1 %vm76_vm0, %v42_v61  ;;  %vm698_vm11 = vcmp.eq.s32.totalorder %v614_v59, %v1511_v2 }
  0x7b   :  { %1070 = vmatprep.mubr.msk.f32.mxu0 %vm76_vm0, %v27_v62  ;;  %1102 = vmatprep.mubr.msk.f32.mxu1 %vm76_vm0, %v43_v63 }
  0x7e   :  { %1071 = vmatmul.mubr.msk.f32.gmra.mxu0 %vm76_vm0, %v27_v62  ;;  %1103 = vmatmul.mubr.msk.f32.gmra.mxu1 %vm76_vm0, %v43_v63  ;;  %v779_v62 = vsel %vm715_vm12, 10.0, %v1162_v7  ;;  %vm719_vm0 = vcmp.eq.s32.totalorder %v624_v0, %v1515_v4  ;;  %v630_v0 = vadd.s32 232, %v1509_v1 }
  0x80   :  { %vm731_vm12 = vcmp.eq.s32.totalorder %v630_v0, %v1515_v4 }
 0x102   :  { %v335_v10 = vpop.f32.mrf.mxu0  ;;  %v431_v11 = vpop.f32.mrf.mxu1 }
 0x103   :  { %v800_v13 = vadd.f32 %v736_v8, %v335_v10  ;;  %896 = vst [vmem:[#allocation2 + $0x100] sm:$0xff] %v431_v11 }
 0x104   :  { %v337_v15 = vpop.f32.mrf.mxu0  ;;  %v433_v16 = vpop.f32.mrf.mxu1 }
 0x105   :  { %864 = vst [vmem:[#allocation2] sm:$0xff] %v800_v13  ;;  %865 = vst [vmem:[#allocation2 + $0x8] sm:$0xff] %v337_v15  ;;  %v833_v18 = vadd.f32 %v769_v12, %v433_v16  ;;  %v781_v12 = vsel %vm717_vm14, 10.0, %v1162_v7  ;;  %vm733_vm14 = vcmp.eq.s32.totalorder %v631_v14, %v1515_v4 }
 0x106   :  { %v341_v20 = vpop.f32.mrf.mxu0  ;;  %v437_v21 = vpop.f32.mrf.mxu1 }
 0x107   :  { %897 = vst [vmem:[#allocation2 + $0x108] sm:$0xff] %v833_v18  ;;  %v802_v23 = vadd.f32 %v738_v17, %v341_v20  ;;  %898 = vst [vmem:[#allocation2 + $0x110] sm:$0xff] %v437_v21  ;;  %v750_v17 = vsel %vm686_vm15, 10.0, %v1162_v7  ;;  %vm702_vm15 = vcmp.eq.s32.totalorder %v616_v19, %v1511_v2 }
 0x108   :  { %v343_v25 = vpop.f32.mrf.mxu0  ;;  %v439_v26 = vpop.f32.mrf.mxu1  ;;  %v766_v34 = vsel %vm702_vm15, 10.0, %v1162_v7 }
 0x109   :  { %866 = vst [vmem:[#allocation2 + $0x10] sm:$0xff] %v802_v23  ;;  %867 = vst [vmem:[#allocation2 + $0x18] sm:$0xff] %v343_v25  ;;  %v835_v28 = vadd.f32 %v771_v22, %v439_v26  ;;  %v783_v22 = vsel %vm719_vm0, 10.0, %v1162_v7  ;;  %vm735_vm0 = vcmp.eq.s32.totalorder %v632_v24, %v1515_v4 }
 0x10a   :  { %v347_v30 = vpop.f32.mrf.mxu0  ;;  %v443_v31 = vpop.f32.mrf.mxu1 }
 0x10b   :  { %899 = vst [vmem:[#allocation2 + $0x118] sm:$0xff] %v835_v28  ;;  %v804_v33 = vadd.f32 %v740_v27, %v347_v30  ;;  %900 = vst [vmem:[#allocation2 + $0x120] sm:$0xff] %v443_v31  ;;  %v752_v27 = vsel %vm688_vm1, 10.0, %v1162_v7 }
 0x10c   :  { %v349_v35 = vpop.f32.mrf.mxu0  ;;  %v445_v36 = vpop.f32.mrf.mxu1 }
 0x10d   :  { %868 = vst [vmem:[#allocation2 + $0x20] sm:$0xff] %v804_v33  ;;  %869 = vst [vmem:[#allocation2 + $0x28] sm:$0xff] %v349_v35  ;;  %v837_v38 = vadd.f32 %v773_v32, %v445_v36  ;;  %v785_v32 = vsel %vm721_vm2, 10.0, %v1162_v7 }
 0x10e   :  { %v353_v40 = vpop.f32.mrf.mxu0  ;;  %v449_v41 = vpop.f32.mrf.mxu1 }
 0x10f   :  { %901 = vst [vmem:[#allocation2 + $0x128] sm:$0xff] %v837_v38  ;;  %v806_v43 = vadd.f32 %v742_v37, %v353_v40  ;;  %902 = vst [vmem:[#allocation2 + $0x130] sm:$0xff] %v449_v41  ;;  %v754_v37 = vsel %vm690_vm3, 10.0, %v1162_v7 }
 0x110   :  { %v355_v45 = vpop.f32.mrf.mxu0  ;;  %v451_v46 = vpop.f32.mrf.mxu1 }
 0x111   :  { %870 = vst [vmem:[#allocation2 + $0x30] sm:$0xff] %v806_v43  ;;  %871 = vst [vmem:[#allocation2 + $0x38] sm:$0xff] %v355_v45  ;;  %v839_v48 = vadd.f32 %v775_v42, %v451_v46  ;;  %v787_v42 = vsel %vm723_vm4, 10.0, %v1162_v7 }
 0x112   :  { %v359_v50 = vpop.f32.mrf.mxu0  ;;  %v455_v51 = vpop.f32.mrf.mxu1 }
 0x113   :  { %903 = vst [vmem:[#allocation2 + $0x138] sm:$0xff] %v839_v48  ;;  %v808_v53 = vadd.f32 %v744_v47, %v359_v50  ;;  %904 = vst [vmem:[#allocation2 + $0x140] sm:$0xff] %v455_v51  ;;  %v756_v47 = vsel %vm692_vm5, 10.0, %v1162_v7 }
 0x114   :  { %v361_v55 = vpop.f32.mrf.mxu0  ;;  %v457_v56 = vpop.f32.mrf.mxu1 }
 0x115   :  { %872 = vst [vmem:[#allocation2 + $0x40] sm:$0xff] %v808_v53  ;;  %873 = vst [vmem:[#allocation2 + $0x48] sm:$0xff] %v361_v55  ;;  %v841_v58 = vadd.f32 %v777_v52, %v457_v56  ;;  %v789_v52 = vsel %vm725_vm6, 10.0, %v1162_v7 }
 0x116   :  { %v365_v60 = vpop.f32.mrf.mxu0  ;;  %v461_v61 = vpop.f32.mrf.mxu1 }
 0x117   :  { %905 = vst [vmem:[#allocation2 + $0x148] sm:$0xff] %v841_v58  ;;  %v810_v63 = vadd.f32 %v746_v57, %v365_v60  ;;  %906 = vst [vmem:[#allocation2 + $0x150] sm:$0xff] %v461_v61  ;;  %v758_v57 = vsel %vm694_vm7, 10.0, %v1162_v7 }
 0x118   :  { %v367_v3 = vpop.f32.mrf.mxu0  ;;  %v463_v5 = vpop.f32.mrf.mxu1 }
 0x119   :  { %874 = vst [vmem:[#allocation2 + $0x50] sm:$0xff] %v810_v63  ;;  %875 = vst [vmem:[#allocation2 + $0x58] sm:$0xff] %v367_v3  ;;  %v843_v8 = vadd.f32 %v779_v62, %v463_v5  ;;  %v791_v62 = vsel %vm727_vm8, 10.0, %v1162_v7 }
 0x11a   :  { %v371_v10 = vpop.f32.mrf.mxu0  ;;  %v467_v11 = vpop.f32.mrf.mxu1 }
 0x11b   :  { %907 = vst [vmem:[#allocation2 + $0x158] sm:$0xff] %v843_v8  ;;  %v812_v13 = vadd.f32 %v748_v6, %v371_v10  ;;  %908 = vst [vmem:[#allocation2 + $0x160] sm:$0xff] %v467_v11  ;;  %v760_v6 = vsel %vm696_vm9, 10.0, %v1162_v7 }
 0x11c   :  { %v373_v15 = vpop.f32.mrf.mxu0  ;;  %v469_v16 = vpop.f32.mrf.mxu1 }
 0x11d   :  { %876 = vst [vmem:[#allocation2 + $0x60] sm:$0xff] %v812_v13  ;;  %877 = vst [vmem:[#allocation2 + $0x68] sm:$0xff] %v373_v15  ;;  %v845_v18 = vadd.f32 %v781_v12, %v469_v16  ;;  %v793_v12 = vsel %vm729_vm10, 10.0, %v1162_v7 }
 0x11e   :  { %v377_v20 = vpop.f32.mrf.mxu0  ;;  %v473_v21 = vpop.f32.mrf.mxu1 }
 0x11f   :  { %909 = vst [vmem:[#allocation2 + $0x168] sm:$0xff] %v845_v18  ;;  %v814_v23 = vadd.f32 %v750_v17, %v377_v20  ;;  %910 = vst [vmem:[#allocation2 + $0x170] sm:$0xff] %v473_v21  ;;  %v762_v17 = vsel %vm698_vm11, 10.0, %v1162_v7 }
 0x120   :  { %v379_v25 = vpop.f32.mrf.mxu0  ;;  %v475_v26 = vpop.f32.mrf.mxu1 }
 0x121   :  { %878 = vst [vmem:[#allocation2 + $0x70] sm:$0xff] %v814_v23  ;;  %879 = vst [vmem:[#allocation2 + $0x78] sm:$0xff] %v379_v25  ;;  %v847_v28 = vadd.f32 %v783_v22, %v475_v26  ;;  %v795_v22 = vsel %vm731_vm12, 10.0, %v1162_v7 }
 0x122   :  { %v383_v30 = vpop.f32.mrf.mxu0  ;;  %v479_v31 = vpop.f32.mrf.mxu1 }
 0x123   :  { %911 = vst [vmem:[#allocation2 + $0x178] sm:$0xff] %v847_v28  ;;  %v816_v33 = vadd.f32 %v752_v27, %v383_v30  ;;  %912 = vst [vmem:[#allocation2 + $0x180] sm:$0xff] %v479_v31  ;;  %v764_v27 = vsel %vm700_vm13, 10.0, %v1162_v7  ;;  %v797_v31 = vsel %vm733_vm14, 10.0, %v1162_v7 }
 0x124   :  { %v385_v35 = vpop.f32.mrf.mxu0  ;;  %v481_v36 = vpop.f32.mrf.mxu1 }
 0x125   :  { %880 = vst [vmem:[#allocation2 + $0x80] sm:$0xff] %v816_v33  ;;  %881 = vst [vmem:[#allocation2 + $0x88] sm:$0xff] %v385_v35  ;;  %v849_v38 = vadd.f32 %v785_v32, %v481_v36 }
 0x126   :  { %v389_v40 = vpop.f32.mrf.mxu0  ;;  %v485_v41 = vpop.f32.mrf.mxu1 }
 0x127   :  { %913 = vst [vmem:[#allocation2 + $0x188] sm:$0xff] %v849_v38  ;;  %v818_v43 = vadd.f32 %v754_v37, %v389_v40  ;;  %914 = vst [vmem:[#allocation2 + $0x190] sm:$0xff] %v485_v41  ;;  %v799_v37 = vsel %vm735_vm0, 10.0, %v1162_v7 }
 0x128   :  { %v391_v45 = vpop.f32.mrf.mxu0  ;;  %v487_v46 = vpop.f32.mrf.mxu1 }
 0x129   :  { %882 = vst [vmem:[#allocation2 + $0x90] sm:$0xff] %v818_v43  ;;  %883 = vst [vmem:[#allocation2 + $0x98] sm:$0xff] %v391_v45  ;;  %v851_v48 = vadd.f32 %v787_v42, %v487_v46 }
 0x12a   :  { %v395_v50 = vpop.f32.mrf.mxu0  ;;  %v491_v51 = vpop.f32.mrf.mxu1 }
 0x12b   :  { %915 = vst [vmem:[#allocation2 + $0x198] sm:$0xff] %v851_v48  ;;  %v820_v53 = vadd.f32 %v756_v47, %v395_v50  ;;  %916 = vst [vmem:[#allocation2 + $0x1a0] sm:$0xff] %v491_v51 }
 0x12c   :  { %v397_v55 = vpop.f32.mrf.mxu0  ;;  %v493_v56 = vpop.f32.mrf.mxu1 }
 0x12d   :  { %884 = vst [vmem:[#allocation2 + $0xa0] sm:$0xff] %v820_v53  ;;  %885 = vst [vmem:[#allocation2 + $0xa8] sm:$0xff] %v397_v55  ;;  %v853_v58 = vadd.f32 %v789_v52, %v493_v56 }
 0x12e   :  { %v401_v60 = vpop.f32.mrf.mxu0  ;;  %v497_v61 = vpop.f32.mrf.mxu1 }
 0x12f   :  { %917 = vst [vmem:[#allocation2 + $0x1a8] sm:$0xff] %v853_v58  ;;  %v822_v63 = vadd.f32 %v758_v57, %v401_v60  ;;  %918 = vst [vmem:[#allocation2 + $0x1b0] sm:$0xff] %v497_v61 }
 0x130   :  { %v403_v3 = vpop.f32.mrf.mxu0  ;;  %v499_v5 = vpop.f32.mrf.mxu1 }
 0x131   :  { %886 = vst [vmem:[#allocation2 + $0xb0] sm:$0xff] %v822_v63  ;;  %887 = vst [vmem:[#allocation2 + $0xb8] sm:$0xff] %v403_v3  ;;  %v855_v8 = vadd.f32 %v791_v62, %v499_v5 }
 0x132   :  { %v407_v10 = vpop.f32.mrf.mxu0  ;;  %v503_v11 = vpop.f32.mrf.mxu1 }
 0x133   :  { %919 = vst [vmem:[#allocation2 + $0x1b8] sm:$0xff] %v855_v8  ;;  %v824_v13 = vadd.f32 %v760_v6, %v407_v10  ;;  %920 = vst [vmem:[#allocation2 + $0x1c0] sm:$0xff] %v503_v11 }
 0x134   :  { %v409_v15 = vpop.f32.mrf.mxu0  ;;  %v505_v16 = vpop.f32.mrf.mxu1 }
 0x135   :  { %888 = vst [vmem:[#allocation2 + $0xc0] sm:$0xff] %v824_v13  ;;  %889 = vst [vmem:[#allocation2 + $0xc8] sm:$0xff] %v409_v15  ;;  %v857_v18 = vadd.f32 %v793_v12, %v505_v16 }
 0x136   :  { %v413_v20 = vpop.f32.mrf.mxu0  ;;  %v509_v21 = vpop.f32.mrf.mxu1 }
 0x137   :  { %921 = vst [vmem:[#allocation2 + $0x1c8] sm:$0xff] %v857_v18  ;;  %v826_v23 = vadd.f32 %v762_v17, %v413_v20  ;;  %922 = vst [vmem:[#allocation2 + $0x1d0] sm:$0xff] %v509_v21 }
 0x138   :  { %v415_v25 = vpop.f32.mrf.mxu0  ;;  %v511_v26 = vpop.f32.mrf.mxu1 }
 0x139   :  { %890 = vst [vmem:[#allocation2 + $0xd0] sm:$0xff] %v826_v23  ;;  %891 = vst [vmem:[#allocation2 + $0xd8] sm:$0xff] %v415_v25  ;;  %v859_v28 = vadd.f32 %v795_v22, %v511_v26 }
 0x13a   :  { %v419_v29 = vpop.f32.mrf.mxu0  ;;  %v515_v30 = vpop.f32.mrf.mxu1 }
 0x13b   :  { %923 = vst [vmem:[#allocation2 + $0x1d8] sm:$0xff] %v859_v28  ;;  %v828_v32 = vadd.f32 %v764_v27, %v419_v29  ;;  %924 = vst [vmem:[#allocation2 + $0x1e0] sm:$0xff] %v515_v30 }
 0x13c   :  { %v421_v33 = vpop.f32.mrf.mxu0  ;;  %v517_v1 = vpop.f32.mrf.mxu1 }
 0x13d   :  { %892 = vst [vmem:[#allocation2 + $0xe0] sm:$0xff] %v828_v32  ;;  %893 = vst [vmem:[#allocation2 + $0xe8] sm:$0xff] %v421_v33  ;;  %v861_v35 = vadd.f32 %v797_v31, %v517_v1 }
 0x13e   :  { %v425_v36 = vpop.f32.mrf.mxu0  ;;  %v521_v2 = vpop.f32.mrf.mxu1 }
 0x13f   :  { %925 = vst [vmem:[#allocation2 + $0x1e8] sm:$0xff] %v861_v35  ;;  %v830_v38 = vadd.f32 %v766_v34, %v425_v36  ;;  %926 = vst [vmem:[#allocation2 + $0x1f0] sm:$0xff] %v521_v2 }
 0x140   :  { %v427_v39 = vpop.f32.mrf.mxu0  ;;  %v523_v40 = vpop.f32.mrf.mxu1 }
 0x141   :  { %894 = vst [vmem:[#allocation2 + $0xf0] sm:$0xff] %v830_v38  ;;  %895 = vst [vmem:[#allocation2 + $0xf8] sm:$0xff] %v427_v39  ;;  %v863_v4 = vadd.f32 %v799_v37, %v523_v40 }
 0x143   :  { %927 = vst [vmem:[#allocation2 + $0x1f8] sm:$0xff] %v863_v4 }
 0x144   :  { %1151 = shalt.err (!%p1148_p4)
}
 0x145   :  { %s1164_s1 = smov 256   ;;  %s1165_s25 = smov 16  }
 0x146   :  { %939 = dma.vmem_to_hbm [thread:$0]  %s934_s23, 8192, %s1617_s2, [#allocation3], %s1164_s1, %s1164_s1, %s1165_s25  }
 0x147   :  { %1160 = dma.done.wait [#allocation3], 8192  }
 0x148   :  { %1161 = vsyncadd [#allocation3], 4294959104 }
 0x149   :  { %943 = vsyncpa [#allocation3], 1 }

</bundles_post_ra>
